<compile_context>
chip_gen: v7x
topology: tpu7x:2x2x1
jax: 0.10.0
libtpu: 0.0.40
codegen_flags: <defaults>
</compile_context>

<pallas_src>
import jax
import jax.numpy as jnp
from jax.experimental import pallas as pl
from jax.experimental.pallas import tpu as pltpu


def mlp_kernel(x_ref, w1_ref, b1_ref, w2_ref, b2_ref, o_ref):
    # x_ref : [tb, F]  batch-major tile (natural HBM layout)
    # w1_ref: [H, F]   resident weights (PyTorch [out, in] layout)
    # b1_ref: [H, 1]   f32
    # w2_ref: [H, 1]   f32
    # b2_ref: [1, 1]   f32 SMEM scalar
    # o_ref : [1, tb]  lane-dense f32 output tile

    # Layer 1: h[H, tb] = W1 @ x^T with the transpose folded into the MXU
    # contraction (trans_b pattern) -- no XLU transpose of the x tile.
    h = jax.lax.dot_general(
        w1_ref[...], x_ref[...],
        dimension_numbers=(((1,), (1,)), ((), ())),
        preferred_element_type=jnp.float32)                    # [H, tb] f32
    h = jnp.maximum(h + b1_ref[...], 0.0)                      # bias + ReLU

    hidden = h.shape[0]
    if hidden <= 256:
        # Small H: VPU broadcast-multiply + sublane (XLU) reduce; keeps the MXU
        # free and uses otherwise-idle VLIW slots.
        y = jnp.sum(h * w2_ref[...], axis=0, keepdims=True)    # [1, tb]
    else:
        # Large H: contract on the MXU instead of materializing the full
        # [H, tb] product through the VPU/XLU path.
        y = jax.lax.dot_general(
            w2_ref[...], h,
            dimension_numbers=(((0,), (0,)), ((), ())),
            preferred_element_type=jnp.float32)                 # [1, tb]

    o_ref[...] = (y + b2_ref[0, 0]).astype(o_ref.dtype)


def _round_up(v, m):
    return ((v + m - 1) // m) * m


def _vmem_budget_bytes():
    """Per-generation VMEM budget for this kernel (queried at trace time).

    v5e/v6e (128 MiB physical) -> ~96 MiB; v7x (64 MiB per TC) -> ~48 MiB.
    Conservative fallback (64 MiB physical assumption) if the query fails.
    """
    cap = 64 * 1024 * 1024
    try:
        info = pltpu.get_tpu_info()
        cap = int(getattr(info, "vmem_capacity_bytes", cap))
    except Exception:
        pass
    return min(int(cap * 3 // 4), 96 * 1024 * 1024)


def _pick_batch_tile(batch, num_features, hidden, x_itemsize, vmem_tile_budget):
    """Largest lane-dense (multiple-of-128) batch tile that

      * divides the batch,
      * fits the double-buffered x tile + resident (double-buffered) weights +
        the f32 [H, tb] layer-1 intermediate inside the VMEM budget,
      * and preferably leaves >= 4 grid programs (>= 2 steps per TensorCore on
        v7x megacore), relaxing to >= 2 then 1 if the batch is small.
    """
    pad_f = max(_round_up(num_features, 128), 128)   # lane padding of x / W1
    pad_h = _round_up(max(hidden, 8), 8)             # sublane padding of H

    # Batch-independent VMEM: resident params, double-buffered by the pipeline.
    fixed = 2 * pad_h * pad_f * 4                    # W1
    fixed += 2 * 2 * pad_h * 128 * 4                 # b1, w2 (each [H,1] lane-padded)

    # Per-batch-row VMEM: 2x x tile + 2x [1, tb] output (sublane-padded to 8)
    # + the f32 [H, tb] intermediate.
    per_row = 2 * pad_f * x_itemsize + 2 * 8 * 4 + pad_h * 4

    avail = max(vmem_tile_budget - fixed, per_row * 128)
    max_tb = max((avail // per_row) // 128 * 128, 128)

    for min_programs in (4, 2, 1):
        cand = max_tb
        while cand >= 128:
            if batch % cand == 0 and batch // cand >= min_programs:
                return cand
            cand -= 128
    return batch   # tiny / odd batch: a single full-array block is always legal


def time_prediction_forward(x, w1, b1, w2, b2, *, batch_tile=None,
                            compute_dtype=None):
    """Forward pass of TimePredictionModel.

    x : [B, F]            activations
    w1: [H, F]   b1: [H]  (PyTorch nn.Linear layout: weight is [out, in])
    w2: [1, H]   b2: [1]
    compute_dtype: optionally cast x and W1 (e.g. jnp.bfloat16 on v6e/v7x to
        halve HBM traffic); accumulation and output stay f32.
    returns: [B, 1] float32
    """
    B, F = x.shape
    H = w1.shape[0]
    assert w1.shape == (H, F) and b1.shape == (H,)
    assert w2.shape == (1, H) and b2.shape == (1,)

    if compute_dtype is not None:
        x = x.astype(compute_dtype)
        w1 = w1.astype(compute_dtype)

    x_itemsize = jnp.dtype(x.dtype).itemsize
    w1_itemsize = jnp.dtype(w1.dtype).itemsize

    vmem_limit = _vmem_budget_bytes()
    if batch_tile is None:
        # Leave ~20% headroom below the compiler limit for internal scratch.
        batch_tile = _pick_batch_tile(B, F, H, x_itemsize,
                                      int(vmem_limit * 0.8))
    assert B % batch_tile == 0, "pad the batch to a multiple of batch_tile"
    assert batch_tile % 8 == 0 or batch_tile == B, (
        "batch_tile must be a multiple of 8 (or the full batch)")

    grid = (B // batch_tile,)

    # Small parameters as f32 column vectors / SMEM scalar (f32 accumulation).
    b1_col = b1.reshape(H, 1).astype(jnp.float32)
    w2_col = w2.reshape(H, 1).astype(jnp.float32)
    b2_s = b2.reshape(1, 1).astype(jnp.float32)

    cost = pl.CostEstimate(
        flops=2 * B * H * (F + 1),
        transcendentals=0,
        bytes_accessed=int(
            x.size * x_itemsize
            + w1.size * w1_itemsize
            + b1_col.size * 4 + w2_col.size * 4 + b2_s.size * 4
            + B * 4),  # f32 output
    )

    out = pl.pallas_call(
        mlp_kernel,
        out_shape=jax.ShapeDtypeStruct((1, B), jnp.float32),
        grid_spec=pltpu.PrefetchScalarGridSpec(
            num_scalar_prefetch=0,
            grid=grid,
            in_specs=[
                pl.BlockSpec((batch_tile, F), lambda i: (i, 0)),    # x tile
                pl.BlockSpec((H, F), lambda i: (0, 0)),             # W1 (resident)
                pl.BlockSpec((H, 1), lambda i: (0, 0)),             # b1
                pl.BlockSpec((H, 1), lambda i: (0, 0)),             # w2
                pl.BlockSpec(memory_space=pltpu.MemorySpace.SMEM),  # b2 scalar
            ],
            out_specs=pl.BlockSpec((1, batch_tile), lambda i: (0, i)),
        ),
        compiler_params=pltpu.CompilerParams(
            dimension_semantics=("parallel",),
            vmem_limit_bytes=vmem_limit,
        ),
        cost_estimate=cost,
    )(x, w1, b1_col, w2_col, b2_s)

    # (1, B) -> (B, 1): element-order-preserving reshape in the wrapper.
    return out.reshape(B, 1)


def init_params(key, num_features, hidden_dim):
    # PyTorch nn.Linear default init: U(-1/sqrt(fan_in), +1/sqrt(fan_in)),
    # weights stored in [out, in] layout.
    k1, k2, k3, k4 = jax.random.split(key, 4)
    bound1 = 1.0 / jnp.sqrt(float(num_features))
    bound2 = 1.0 / jnp.sqrt(float(hidden_dim))
    w1 = jax.random.uniform(k1, (hidden_dim, num_features), jnp.float32,
                            minval=-bound1, maxval=bound1)
    b1 = jax.random.uniform(k2, (hidden_dim,), jnp.float32,
                            minval=-bound1, maxval=bound1)
    w2 = jax.random.uniform(k3, (1, hidden_dim), jnp.float32,
                            minval=-bound2, maxval=bound2)
    b2 = jax.random.uniform(k4, (1,), jnp.float32,
                            minval=-bound2, maxval=bound2)
    return w1, b1, w2, b2


if __name__ == "__main__":
    num_features = 16
    hidden_dim = 32
    batch = 256  # small, but a multiple of 128 so the lane-dense tiled path
                 # (batch_tile=128, grid=(2,)) is exercised.

    key = jax.random.PRNGKey(0)
    kx, kp = jax.random.split(key)
    x = jax.random.normal(kx, (batch, num_features), jnp.float32)
    w1, b1, w2, b2 = init_params(kp, num_features, hidden_dim)

    # Pure-JAX reference (same semantics as the PyTorch module).
    ref = jnp.maximum(x @ w1.T + b1[None, :], 0.0) @ w2.T + b2[None, :]

    # f32 path (exact).
    out = jax.block_until_ready(time_prediction_forward(x, w1, b1, w2, b2))
    assert out.shape == (batch, 1)
    assert out.dtype == jnp.float32
    assert jnp.allclose(out, ref, atol=1e-4, rtol=1e-4)

    # bf16 activations/weights (recommended bandwidth-bound config on v6e/v7x);
    # accumulation and output stay f32, so only small rounding error remains.
    out_bf16 = jax.block_until_ready(
        time_prediction_forward(x, w1, b1, w2, b2, compute_dtype=jnp.bfloat16))
    assert out_bf16.shape == (batch, 1)
    assert jnp.allclose(out_bf16, ref, atol=0.1, rtol=0.1)

    print("KERNEL_OK")
</pallas_src>

<mosaic_0001>
module attributes {stable_mosaic.version = 11 : i64} {
  func.func @mlp_kernel(%arg0: i32, %arg1: memref<128x16xf32, #tpu.memory_space<vmem>>, %arg2: memref<32x16xf32, #tpu.memory_space<vmem>>, %arg3: memref<32x1xf32, #tpu.memory_space<vmem>>, %arg4: memref<32x1xf32, #tpu.memory_space<vmem>>, %arg5: memref<1x1xf32, #tpu.memory_space<smem>>, %arg6: memref<1x128xf32, #tpu.memory_space<vmem>>) attributes {dimension_semantics = [#tpu.dimension_semantics<parallel>], iteration_bounds = array<i64: 2>, scalar_prefetch = 0 : i64, scratch_operands = 0 : i64, tpu.core_type = #tpu.core_type<tc>, window_params = [{transform_indices = @transform_0, window_bounds = array<i64: 128, 16>}, {pipeline_mode = #tpu.pipeline_mode<synchronous>, transform_indices = @transform_1, window_bounds = array<i64: 32, 16>}, {pipeline_mode = #tpu.pipeline_mode<synchronous>, transform_indices = @transform_2, window_bounds = array<i64: 32, 1>}, {pipeline_mode = #tpu.pipeline_mode<synchronous>, transform_indices = @transform_3, window_bounds = array<i64: 32, 1>}, {transform_indices = @transform_4, window_bounds = array<i64: 1, 1>}, {transform_indices = @transform_5, window_bounds = array<i64: 1, 128>}]} {
    %c0 = arith.constant 0 : index
    %c0_0 = arith.constant 0 : index
    %0 = vector.load %arg2[%c0, %c0_0] : memref<32x16xf32, #tpu.memory_space<vmem>>, vector<32x16xf32>
    %c0_1 = arith.constant 0 : index
    %c0_2 = arith.constant 0 : index
    %1 = vector.load %arg1[%c0_1, %c0_2] : memref<128x16xf32, #tpu.memory_space<vmem>>, vector<128x16xf32>
    %cst = arith.constant dense<0.000000e+00> : vector<32x128xf32>
    %2 = tpu.matmul %0, %1, %cst {dimension_numbers = #tpu.dot_dimension_numbers<[1], [1], [0], [0], [0, 0, 1, 0], [], []>} : vector<32x16xf32>, vector<128x16xf32>, vector<32x128xf32> -> vector<32x128xf32>
    %c0_3 = arith.constant 0 : index
    %c0_4 = arith.constant 0 : index
    %3 = vector.load %arg3[%c0_3, %c0_4] : memref<32x1xf32, #tpu.memory_space<vmem>>, vector<32x1xf32>
    %4 = vector.broadcast %3 : vector<32x1xf32> to vector<32x128xf32>
    %5 = arith.addf %2, %4 : vector<32x128xf32>
    %cst_5 = arith.constant 0.000000e+00 : f32
    %6 = vector.broadcast %cst_5 : f32 to vector<32x128xf32>
    %7 = arith.maximumf %5, %6 : vector<32x128xf32>
    %c0_6 = arith.constant 0 : index
    %c0_7 = arith.constant 0 : index
    %8 = vector.load %arg4[%c0_6, %c0_7] : memref<32x1xf32, #tpu.memory_space<vmem>>, vector<32x1xf32>
    %9 = vector.broadcast %8 : vector<32x1xf32> to vector<32x128xf32>
    %10 = arith.mulf %7, %9 : vector<32x128xf32>
    %cst_8 = arith.constant dense<0.000000e+00> : vector<128xf32>
    %11 = vector.multi_reduction <add>, %10, %cst_8 [0] : vector<32x128xf32> to vector<128xf32>
    %12 = vector.shape_cast %11 : vector<128xf32> to vector<1x128xf32>
    %c0_9 = arith.constant 0 : index
    %c0_10 = arith.constant 0 : index
    %13 = memref.load %arg5[%c0_9, %c0_10] : memref<1x1xf32, #tpu.memory_space<smem>>
    %14 = vector.broadcast %13 : f32 to vector<1x128xf32>
    %15 = arith.addf %12, %14 : vector<1x128xf32>
    %c0_11 = arith.constant 0 : index
    %c0_12 = arith.constant 0 : index
    %16 = vector.load %arg6[%c0_11, %c0_12] : memref<1x128xf32, #tpu.memory_space<vmem>>, vector<1x128xf32>
    tpu.vector_store %arg6[%c0_11, %c0_12], %15 {strides = array<i32>} : memref<1x128xf32, #tpu.memory_space<vmem>>, vector<1x128xf32>,
    return
  }
  func.func @transform_0(%arg0: i32) -> (i32, i32) {
    %c0_i32 = arith.constant 0 : i32
    %c0_i32_0 = arith.constant 0 : i32
    return %arg0, %c0_i32 : i32, i32
  }
  func.func @transform_1(%arg0: i32) -> (i32, i32) {
    %c0_i32 = arith.constant 0 : i32
    %c0_i32_0 = arith.constant 0 : i32
    %c0_i32_1 = arith.constant 0 : i32
    return %c0_i32, %c0_i32_0 : i32, i32
  }
  func.func @transform_2(%arg0: i32) -> (i32, i32) {
    %c0_i32 = arith.constant 0 : i32
    %c0_i32_0 = arith.constant 0 : i32
    %c0_i32_1 = arith.constant 0 : i32
    return %c0_i32, %c0_i32_0 : i32, i32
  }
  func.func @transform_3(%arg0: i32) -> (i32, i32) {
    %c0_i32 = arith.constant 0 : i32
    %c0_i32_0 = arith.constant 0 : i32
    %c0_i32_1 = arith.constant 0 : i32
    return %c0_i32, %c0_i32_0 : i32, i32
  }
  func.func @transform_4(%arg0: i32) -> (i32, i32) {
    %c0_i32 = arith.constant 0 : i32
    %c0_i32_0 = arith.constant 0 : i32
    %c0_i32_1 = arith.constant 0 : i32
    return %c0_i32, %c0_i32_0 : i32, i32
  }
  func.func @transform_5(%arg0: i32) -> (i32, i32) {
    %c0_i32 = arith.constant 0 : i32
    %c0_i32_0 = arith.constant 0 : i32
    return %c0_i32, %arg0 : i32, i32
  }
}

</mosaic_0001>

<bundles_post_ra>
// kernel: tpu_custom_call.1
= control target key start
LH: loop header
LB: loop body
LE: loop exit
PB: predicated region body
PF: predicated region fallthrough
CT: control target
= control target key end

     0   :  { %s1047_s0 = inlined_call_operand.vmem [shape: f32[256,16], index: 0, kind: input, shape index: {}]   ;;  %s1048_s1 = inlined_call_operand.vmem [shape: f32[32,16], index: 1, kind: input, shape index: {}]   ;;  %s1049_s2 = inlined_call_operand.vmem [shape: f32[32,1], index: 2, kind: input, shape index: {}]   ;;  %s1050_s3 = inlined_call_operand.vmem [shape: f32[32,1], index: 3, kind: input, shape index: {}]   ;;  %s1051_s4 = inlined_call_operand.<no memory space> [shape: f32[1,1], index: 4, kind: input, shape index: {}]   ;;  %s1052_s5 = inlined_call_operand.hbm [shape: f32[1,256], index: 5, kind: output, shape index: {}]  }
   0x1   :  { %10 = sst [smem:[#allocation2]] %s1051_s4 }
   0x2   :  { %11 = vsyncpa [#allocation4], 0 }
   0x3   :  { %13 = vsyncpa [#allocation4 + $0x1], 0  ;;  %s820_s20 = smov 0   ;;  %s822_s21 = smov 0  }
   0x4   :  { %s824_s22 = smov 0   ;;  %s826_s23 = smov 0  }
   0x5 LB: > { %s527_s4 = sadd.s32 4294967295, %s783_s23   ;;  %s528_s24 = sadd.s32 4294967294, %s783_s23   ;;  %s783_s23 = sphi %s826_s23, %s1060_s23   ;;  %s779_s22 = sphi %s824_s22, %s1059_s22   ;;  %s775_s21 = sphi %s822_s21, %s1058_s21   ;;  %s771_s20 = sphi %s820_s20, %s1057_s20  }
   0x6   : > { %s843_s25 = sadd.s32 1, %s783_s23   ;;  %s136_s26 = sadd.s32 1, %s779_s22 }
   0x7   : > { %s133_s27 = ssub.s32 %s783_s23, %s843_s25  ;;  %p146_p0 = scmp.ne.s32.totalorder %s779_s22, %s775_s21 }
   0x8   : > { %p134_p1 = scmp.eq.s32.totalorder %s133_s27, 0  ;;  %p147_p2 = scmp.eq.s32.totalorder %s527_s4, 1 }
   0x9   : > { %p152_p3 = scmp.ne.s32.totalorder %s775_s21, %s771_s20  ;;  %p153_p4 = scmp.eq.s32.totalorder %s528_s24, 1 }
   0xa   : > { %s853_s28 = scalar_select %p134_p1, %s779_s22, %s136_s26  }
   0xb   : > { %p855_p5 = por %p147_p2, %p146_p0  ;;  %p859_p6 = por %p153_p4, %p152_p3 }
   0xc   : > { %p531_p7 = scmp.ge.s32.totalorder %s783_s23, 1  ;;  %p192_p8 = scmp.lt.s32.totalorder %s783_s23, 3 }
   0xe   : > { %p193_p9 = pnand %p531_p7, %p192_p8 }
   0xf   : > { %s865_s6 = sshll.u32 (!%p193_p9), %s527_s4, 4  ;;  %vm269_vm0 = vcmask (!%p193_p9), 130048   ;;  %v225_v0 = vld [vmem:[%s1048_s1] sm:$0xff] (!%p193_p9)  ;;  %v227_v1 = vld [vmem:[%s1048_s1 + $0x10] sm:$0xff] (!%p193_p9)  ;;  %v785_v3 = vmov (!%p193_p9), 0   ;;  %v246_v5 = vld [vmem:[%s1049_s2 + $0x8] sm:$0xff] (!%p193_p9) }
  0x10   : > { %196 = sbr.rel (%p193_p9) target bundleno = 347 (0x15b), region = 40  ;;  %p220_p10 = scmp.lt.s32.totalorder (!%p193_p9), %s865_s6, 31  ;;  %609 = vmatprep.mubr.msk.f32.mxu0 (!%p193_p9), %vm269_vm0, %v225_v0  ;;  %612 = vmatprep.mubr.msk.f32.mxu1 (!%p193_p9), %vm269_vm0, %v227_v1  ;;  %v245_v2 = vld [vmem:[%s1049_s2] sm:$0xff] (!%p193_p9)  ;;  %v247_v4 = vld [vmem:[%s1049_s2 + $0x10] sm:$0xff] (!%p193_p9)  ;;  %v248_v6 = vld [vmem:[%s1049_s2 + $0x18] sm:$0xff] (!%p193_p9) }
  0x11   : > { %719 = vset.pattern.permute.xlu0 (!%p193_p9), %v785_v3  ;;  %720 = vset.pattern.permute.xlu1 (!%p193_p9), %v785_v3  ;;  %vm896_vm1 = vmpackc.low (!%p193_p9), %vm269_vm0, %vm269_vm0  ;;  %v419_v14 = vld [vmem:[%s1050_s3] sm:$0xff] (!%p193_p9)  ;;  %v420_v15 = vld [vmem:[%s1050_s3 + $0x8] sm:$0xff] (!%p193_p9)  ;;  %s456_s19 = sld [smem:[#allocation2]] (!%p193_p9)  ;;  %s1005_s8 = scalar_lea.hbm (!%p193_p9), %s1052_s5, %s865_s6 }
  0x12   : > { %251 = vperm.xlu0 (!%p193_p9), %719, %v245_v2   ;;  %261 = vperm.xlu1 (!%p193_p9), %720, %v247_v4   ;;  %v421_v18 = vld [vmem:[%s1050_s3 + $0x10] sm:$0xff] (!%p193_p9)  ;;  %v422_v19 = vld [vmem:[%s1050_s3 + $0x18] sm:$0xff] (!%p193_p9)  ;;  %v226_v36 = vld [vmem:[%s1048_s1 + $0x8] sm:$0xff] (!%p193_p9)  ;;  %s786_s11 = smov (!%p193_p9), [#allocation3]  }
  0x13   : > { %v228_v37 = vld [vmem:[%s1048_s1 + $0x18] sm:$0xff] (!%p193_p9)  ;;  %s725_s12 = sshll.u32 (!%p193_p9), %s786_s11, 4  ;;  %s726_s12 = int_to_ptr.vmem [resolvable:$false] %s725_s12 }
  0x14   : > { %s727_s13 = scalar_lea.vmem (!%p193_p9), %s726_s12, 32 }
  0x16   : > { %256 = vperm.xlu0 (!%p193_p9), %719, %v246_v5   ;;  %266 = vperm.xlu1 (!%p193_p9), %720, %v248_v6  }
  0x17   : > { %s221_s15 = scalar_select %p220_p10, %s865_s6, 31  ;;  %v457_v6 = vstv %s456_s19 }
  0x19   : > { %s533_s4 = sshll.u32 %s221_s15, 3 }
  0x1a   : > { %s892_s27 = scalar_lea.vmem %s1047_s0, %s533_s4  ;;  %425 = vperm.xlu0 %719, %v419_v14   ;;  %430 = vperm.xlu1 %720, %v420_v15   ;;  %s217_s4 = sand.u32 1, %s775_s21  }
  0x1b   : > { %v229_v8 = vld [vmem:[%s892_s27] sm:$0xff]  ;;  %v230_v9 = vld [vmem:[%s892_s27 + $0x8] sm:$0xff]  ;;  %v231_v10 = vld [vmem:[%s892_s27 + $0x10] sm:$0xff]  ;;  %s218_s24 = scalar_lea.vmem [#allocation3], %s217_s4  ;;  %s461_s9 = scalar_lea.sflag [#allocation4], %s217_s4 }
  0x1c   : > { %v615_v11 = vpack.c.bf16 %v230_v9, %v229_v8  ;;  %v232_v12 = vld [vmem:[%s892_s27 + $0x18] sm:$0xff]  ;;  %v233_v16 = vld [vmem:[%s892_s27 + $0x20] sm:$0xff]  ;;  %v234_v17 = vld [vmem:[%s892_s27 + $0x28] sm:$0xff]  ;;  %s473_s26 = sshll.u32 %s218_s24, 4  ;;  %s1007_s26 = int_to_ptr.vmem [resolvable:$true] %s473_s26 }
  0x1d   : > { %v621_v13 = vpack.c.bf16 %v232_v12, %v231_v10  ;;  %v627_v20 = vpack.c.bf16 %v234_v17, %v233_v16  ;;  %v235_v21 = vld [vmem:[%s892_s27 + $0x30] sm:$0xff]  ;;  %v236_v22 = vld [vmem:[%s892_s27 + $0x38] sm:$0xff]  ;;  %v237_v24 = vld [vmem:[%s892_s27 + $0x40] sm:$0xff]  ;;  %s721_s10 = scalar_lea.vmem %s1007_s26, 16  ;;  %p728_p0 = scmp.lt.s32.totalorder %s1007_s26, %s726_s12 }
  0x1e   : > { %617 = vmatprep.subr.msk.bf16.mxu0 %vm896_vm1, %v615_v11  ;;  %663 = vmatprep.subr.msk.bf16.mxu1 %vm896_vm1, %v615_v11  ;;  %v633_v23 = vpack.c.bf16 %v236_v22, %v235_v21  ;;  %v238_v25 = vld [vmem:[%s892_s27 + $0x48] sm:$0xff]  ;;  %v239_v27 = vld [vmem:[%s892_s27 + $0x50] sm:$0xff]  ;;  %v240_v28 = vld [vmem:[%s892_s27 + $0x58] sm:$0xff]  ;;  %p722_p11 = scmp.ne.s32.totalorder %s1007_s26, %s721_s10  ;;  %p729_p1 = scmp.lt.s32.totalorder %s727_s13, %s721_s10 }
  0x1f   : > { %620 = vmatpush3.bf16.xpose.msk.msra.mxu0 %vm896_vm1, %v615_v11  ;;  %671 = vmatpush3.bf16.xpose.msk.msra.mxu1 %vm896_vm1, %v615_v11  ;;  %v639_v26 = vpack.c.bf16 %v238_v25, %v237_v24  ;;  %v645_v29 = vpack.c.bf16 %v240_v28, %v239_v27  ;;  %v241_v30 = vld [vmem:[%s892_s27 + $0x60] sm:$0xff]  ;;  %v242_v31 = vld [vmem:[%s892_s27 + $0x68] sm:$0xff]  ;;  %v243_v33 = vld [vmem:[%s892_s27 + $0x70] sm:$0xff] }
  0x20   : > { %623 = vmatprep.subr.msk.bf16.mxu0 %vm896_vm1, %v621_v13  ;;  %664 = vmatprep.subr.msk.bf16.mxu1 %vm896_vm1, %v621_v13  ;;  %v651_v32 = vpack.c.bf16 %v242_v31, %v241_v30  ;;  %v244_v34 = vld [vmem:[%s892_s27 + $0x78] sm:$0xff]  ;;  %p723_p12 = pnand %p722_p11, %p855_p5  ;;  %p730_p2 = por %p729_p1, %p728_p0 }
  0x21   : > { %435 = vperm.xlu0 %719, %v421_v18   ;;  %440 = vperm.xlu1 %720, %v422_v19   ;;  %v657_v35 = vpack.c.bf16 %v244_v34, %v243_v33 }
  0x22   : > { %p724_p13 = pneg %p723_p12 }
  0x24   : > { %p731_p3 = pnand %p730_p2, %p724_p13 }
  0x27   : > { %626 = vmatpush3.bf16.xpose.msk.msra.mxu0 %vm896_vm1, %v621_v13  ;;  %672 = vmatpush3.bf16.xpose.msk.msra.mxu1 %vm896_vm1, %v621_v13 }
  0x28   : > { %629 = vmatprep.subr.msk.bf16.mxu0 %vm896_vm1, %v627_v20  ;;  %665 = vmatprep.subr.msk.bf16.mxu1 %vm896_vm1, %v627_v20 }
  0x2f   : > { %632 = vmatpush3.bf16.xpose.msk.msra.mxu0 %vm896_vm1, %v627_v20  ;;  %673 = vmatpush3.bf16.xpose.msk.msra.mxu1 %vm896_vm1, %v627_v20 }
  0x30   : > { %635 = vmatprep.subr.msk.bf16.mxu0 %vm896_vm1, %v633_v23  ;;  %666 = vmatprep.subr.msk.bf16.mxu1 %vm896_vm1, %v633_v23 }
  0x37   : > { %638 = vmatpush3.bf16.xpose.msk.msra.mxu0 %vm896_vm1, %v633_v23  ;;  %674 = vmatpush3.bf16.xpose.msk.msra.mxu1 %vm896_vm1, %v633_v23 }
  0x38   : > { %641 = vmatprep.subr.msk.bf16.mxu0 %vm896_vm1, %v639_v26  ;;  %667 = vmatprep.subr.msk.bf16.mxu1 %vm896_vm1, %v639_v26 }
  0x3f   : > { %644 = vmatpush3.bf16.xpose.msk.msra.mxu0 %vm896_vm1, %v639_v26  ;;  %675 = vmatpush3.bf16.xpose.msk.msra.mxu1 %vm896_vm1, %v639_v26 }
  0x40   : > { %647 = vmatprep.subr.msk.bf16.mxu0 %vm896_vm1, %v645_v29  ;;  %668 = vmatprep.subr.msk.bf16.mxu1 %vm896_vm1, %v645_v29 }
  0x47   : > { %650 = vmatpush3.bf16.xpose.msk.msra.mxu0 %vm896_vm1, %v645_v29  ;;  %676 = vmatpush3.bf16.xpose.msk.msra.mxu1 %vm896_vm1, %v645_v29 }
  0x48   : > { %653 = vmatprep.subr.msk.bf16.mxu0 %vm896_vm1, %v651_v32  ;;  %669 = vmatprep.subr.msk.bf16.mxu1 %vm896_vm1, %v651_v32 }
  0x4f   : > { %656 = vmatpush3.bf16.xpose.msk.msra.mxu0 %vm896_vm1, %v651_v32  ;;  %677 = vmatpush3.bf16.xpose.msk.msra.mxu1 %vm896_vm1, %v651_v32 }
  0x50   : > { %659 = vmatprep.subr.msk.bf16.mxu0 %vm896_vm1, %v657_v35  ;;  %670 = vmatprep.subr.msk.bf16.mxu1 %vm896_vm1, %v657_v35 }
  0x57   : > { %662 = vmatpush3.bf16.xpose.msk.msra.mxu0 %vm896_vm1, %v657_v35  ;;  %678 = vmatpush3.bf16.xpose.msk.msra.mxu1 %vm896_vm1, %v657_v35 }
  0x5e   : > { %610 = vmatmul.mubr.msk.f32.vlgmr.msra.gmra.mrb[0].mxu0 %vm269_vm0, %v226_v36  ;;  %613 = vmatmul.mubr.msk.f32.vlgmr.msra.gmra.mrb[0].mxu1 %vm269_vm0, %v228_v37 }
  0x91   : > { %v252_v38 = vpop.permute.xlu0 %251  ;;  %v262_v39 = vpop.permute.xlu1 %261 }
  0x95   : > { %v257_v40 = vpop.permute.xlu0 %256  ;;  %v267_v41 = vpop.permute.xlu1 %266 }
  0x99   : > { %v426_v42 = vpop.permute.xlu0 %425  ;;  %v431_v51 = vpop.permute.xlu1 %430 }
  0xa0   : > { %v436_v58 = vpop.permute.xlu0 %435  ;;  %v441_v61 = vpop.permute.xlu1 %440 }
 0x131   : > { %v611_v43 = vpop.f32.mrb[0].mxu0  ;;  %v614_v44 = vpop.f32.mrb[0].mxu1 }
 0x132   : > { %v402_v45 = vadd.f32 %v611_v43, %v257_v40  ;;  %v396_v46 = vpop.f32.mrb[1].mxu0  ;;  %v406_v47 = vpop.f32.mrb[1].mxu1  ;;  %v412_v48 = vadd.f32 %v614_v44, %v267_v41 }
 0x133   : > { %v397_v49 = vadd.f32 %v396_v46, %v252_v38  ;;  %v407_v50 = vadd.f32 %v406_v47, %v262_v39 }
 0x134   : > { %v416_v52 = vmax.f32 %v402_v45, 0.0  ;;  %v418_v56 = vmax.f32 %v412_v48, 0.0 }
 0x135   : > { %v415_v53 = vmax.f32 %v397_v49, 0.0  ;;  %v417_v54 = vmax.f32 %v407_v50, 0.0 }
 0x136   : > { %v444_v55 = vmul.f32 %v431_v51, %v416_v52  ;;  %v446_v62 = vmul.f32 %v441_v61, %v418_v56 }
 0x137   : > { %v443_v57 = vmul.f32 %v426_v42, %v415_v53  ;;  %v445_v60 = vmul.f32 %v436_v58, %v417_v54 }
 0x139   : > { %v447_v59 = vadd.f32 %v444_v55, %v443_v57 }
 0x13b   : > { %v448_v63 = vadd.f32 %v447_v59, %v445_v60 }
 0x13d   : > { %v449_v0 = vadd.f32 %v448_v63, %v446_v62 }
 0x13f   : > { %v450_v1 = vrot.slane %v449_v0, 4 }
 0x141   : > { %v451_v2 = vadd.f32 %v450_v1, %v449_v0 }
 0x143   : > { %v452_v3 = vrot.slane %v451_v2, 2 }
 0x145   : > { %v453_v4 = vadd.f32 %v452_v3, %v451_v2 }
 0x147   : > { %v454_v5 = vrot.slane %v453_v4, 1 }
 0x149   : > { %v455_v7 = vadd.f32 %v454_v5, %v453_v4 }
 0x14b   : > { %v458_v8 = vadd.f32 %v457_v6, %v455_v7 }
 0x14d   : > { %459 = vst [vmem:[%s218_s24] sm:$0x1] %v458_v8 }
 0x14e   : > { %734 = shalt.err (!%p731_p3)
}
 0x14f   : > { %s735_s6 = scalar_lea.hbm %s1005_s8, 16  ;;  %s739_s16 = scalar_lea.hbm %s1052_s5, 32 }
 0x150   : > { %p736_p4 = scmp.ne.s32.totalorder %s1005_s8, %s735_s6  ;;  %p740_p9 = scmp.lt.u32.totalorder %s1005_s8, %s1052_s5 }
 0x151   : > { %p741_p10 = scmp.lt.u32.totalorder %s739_s16, %s735_s6  ;;  %p743_p12 = scmp.lt.u32.totalorder %s735_s6, %s1005_s8 }
 0x152   : > { %p737_p7 = pnand %p736_p4, %p855_p5 }
 0x153   : > { %p742_p11 = por %p741_p10, %p740_p9 }
 0x154   : > { %p738_p8 = pneg %p737_p7 }
 0x155   : > { %p744_p13 = por %p743_p12, %p742_p11 }
 0x157   : > { %p745_p0 = pnand %p744_p13, %p738_p8 }
 0x159   : > { %748 = shalt.err (!%p745_p0)
}
 0x15a   : > { %679 = dma.vmem_to_hbm [thread:$0]  (%p855_p5), %s1007_s26, 16, %s1005_s8, %s461_s9  }
 0x15b PF: > { %p685_p1 = scmp.ge.s32.totalorder %s783_s23, 2  ;;  %s485_s19 = sand.u32 1, %s771_s20  }
 0x15c   : > { %s486_s4 = scalar_lea.sflag [#allocation4], %s485_s19 }
 0x15d   : > { %p682_p2 = pnand %p685_p1, %p859_p6 }
 0x15f   : > { %766 = dma.done.wait (!%p682_p2), %s486_s4, 16  }
 0x160   : > { %768 = vsyncadd (!%p682_p2), %s486_s4, 4294967280  ;;  %p16_p3 = scmp.ge.s32.totalorder %s843_s25, 4   ;;  %s1057_s20 = smov %s775_s21 }
 0x161   : > { %s1058_s21 = smov %s779_s22  ;;  %s1059_s22 = smov %s853_s28 }
 0x162   : > { %s1060_s23 = smov %s843_s25  ;;  %18 = sbr.rel (!%p16_p3) target bundleno = 5 (0x5), region = 75 }
 0x169   :  { %490 = vsyncpa [#allocation4], 1 }
 0x16a   :  { %492 = vsyncpa [#allocation4 + $0x1], 1 }

</bundles_post_ra>
